<compile_context>
chip_gen: v6e
topology: v6e:2x2x1
jax: 0.10.0
libtpu: 0.0.40
codegen_flags: <defaults>
</compile_context>

<pallas_src>
import jax
import jax.numpy as jnp
from jax.experimental import pallas as pl
from jax.experimental.pallas import tpu as pltpu

LANE = 128


def policy_kernel(x_ref, w1_ref, b1_ref, w2_ref, b2_ref, w3_ref, b3_ref, o_ref):
    x = x_ref[...]            # (TB, F) f32 — real input width, no lane padding
    w1 = w1_ref[...]          # (F, H1p) f32
    f = x.shape[1]

    # ---- layer 1: Linear -> ReLU as F broadcast-FMAs on the VPU -----------
    # (F is tiny; an unrolled FMA chain beats a K-padded MXU matmul and avoids
    #  reading 128 padded lanes of x from HBM.)
    acc = x[:, 0:1] * w1[0:1, :]
    for k in range(1, f):
        acc = acc + x[:, k:k + 1] * w1[k:k + 1, :]
    h = jnp.maximum(acc + b1_ref[...], 0.0)                     # (TB, H1p)

    # ---- layer 2: Linear -> ReLU (MXU, f32 accumulate) ---------------------
    h = jnp.dot(h, w2_ref[...], preferred_element_type=jnp.float32)
    h = jnp.maximum(h + b2_ref[...], 0.0)                       # (TB, H2p)

    # ---- layer 3: lane-dense matmul, then slice to the real action columns -
    logits = jnp.dot(h, w3_ref[...], preferred_element_type=jnp.float32)
    logits = logits + b3_ref[...]                               # (TB, Ap)
    a = o_ref.shape[1]
    logits = logits[:, :a]                                      # (TB, A)

    # ---- softmax over torch dim=1 (real lanes only; exact reciprocal) ------
    m = jnp.max(logits, axis=-1, keepdims=True)
    e = jnp.exp(logits - m)
    denom = jnp.sum(e, axis=-1, keepdims=True)
    o_ref[...] = (e / denom).astype(o_ref.dtype)


def _cdiv(a, b):
    return -(-a // b)


def _round_up(x, m):
    return (x + m - 1) // m * m


def _pad2(a, rows, cols):
    a = jnp.asarray(a, jnp.float32)
    r, c = a.shape
    return jnp.pad(a, ((0, rows - r), (0, cols - c)))


def _choose_batch_tile(B, block_batch):
    """Pick (TB, Bp) minimizing padding; >=2 grid steps for mid/large batches."""
    n_steps = max(_cdiv(B, block_batch), 1)
    # Split into >=2 steps when the batch is big enough, so the "parallel"
    # grid axis can shard across v7x's two TensorCores.
    if n_steps < 2 and B >= 256:
        n_steps = 2
    tb = _round_up(_cdiv(B, n_steps), 8)
    bp = _round_up(B, tb)
    return tb, bp


def policy_forward(x, params, *, block_batch=1024):
    """x: (B, input_dim) f32.  params: dict of w1,b1,w2,b2,w3,b3 (f32)."""
    w1, b1 = params["w1"], params["b1"]
    w2, b2 = params["w2"], params["b2"]
    w3, b3 = params["w3"], params["b3"]

    B, F = x.shape
    H1, H2, A = w1.shape[1], w2.shape[1], w3.shape[1]

    # Hidden dims lane-dense (weights are VMEM-resident, so padding is free);
    # x and the output stay at their real widths.
    H1p = _round_up(H1, LANE)
    H2p = _round_up(H2, LANE)
    Ap = _round_up(A, LANE)

    TB, Bp = _choose_batch_tile(B, block_batch)

    xp = _pad2(jnp.asarray(x, jnp.float32), Bp, F)          # (Bp, F) f32
    w1p = _pad2(w1, F, H1p)
    w2p = _pad2(w2, H1p, H2p)
    w3p = _pad2(w3, H2p, Ap)
    b1p = _pad2(jnp.reshape(b1, (1, -1)), 1, H1p)
    b2p = _pad2(jnp.reshape(b2, (1, -1)), 1, H2p)
    b3p = _pad2(jnp.reshape(b3, (1, -1)), 1, Ap)

    grid = (Bp // TB,)
    const = lambda i: (0, 0)   # weights / biases resident across grid steps

    cost = pl.CostEstimate(
        flops=2 * Bp * (F * H1p + H1p * H2p + H2p * Ap),
        transcendentals=Bp * A,
        bytes_accessed=(xp.size + w1p.size + b1p.size + w2p.size + b2p.size
                        + w3p.size + b3p.size + Bp * A) * 4,
    )

    out = pl.pallas_call(
        policy_kernel,
        out_shape=jax.ShapeDtypeStruct((Bp, A), jnp.float32),
        grid=grid,
        in_specs=[
            pl.BlockSpec((TB, F), lambda i: (i, 0)),   # last dim == full dim -> legal
            pl.BlockSpec((F, H1p), const),
            pl.BlockSpec((1, H1p), const),
            pl.BlockSpec((H1p, H2p), const),
            pl.BlockSpec((1, H2p), const),
            pl.BlockSpec((H2p, Ap), const),
            pl.BlockSpec((1, Ap), const),
        ],
        out_specs=pl.BlockSpec((TB, A), lambda i: (i, 0)),  # compact writeback
        compiler_params=pltpu.CompilerParams(
            dimension_semantics=("parallel",),
        ),
        cost_estimate=cost,
    )(xp, w1p, b1p, w2p, b2p, w3p, b3p)

    # Only padded batch rows need trimming (A*4 bytes/row — negligible).
    return out[:B]


def init_params(key, input_dim, action_shape):
    """Deterministic init mimicking torch.nn.Linear's U(-1/sqrt(fan_in), ...)."""
    def linear(k, fan_in, fan_out):
        kw, kb = jax.random.split(k)
        bound = 1.0 / jnp.sqrt(float(fan_in))
        # stored as (in_features, out_features) so kernel computes x @ W
        w = jax.random.uniform(kw, (fan_in, fan_out), jnp.float32, -bound, bound)
        b = jax.random.uniform(kb, (1, fan_out), jnp.float32, -bound, bound)
        return w, b

    k1, k2, k3 = jax.random.split(key, 3)
    w1, b1 = linear(k1, input_dim, 64)
    w2, b2 = linear(k2, 64, 32)
    w3, b3 = linear(k3, 32, action_shape)
    return {"w1": w1, "b1": b1, "w2": w2, "b2": b2, "w3": w3, "b3": b3}


def reference_forward(x, p):
    h1 = jnp.maximum(x @ p["w1"] + p["b1"], 0.0)
    h2 = jnp.maximum(h1 @ p["w2"] + p["b2"], 0.0)
    logits = h2 @ p["w3"] + p["b3"]
    return jax.nn.softmax(logits, axis=1)


if __name__ == "__main__":
    # CartPole-like shapes: input_shape=(4,), action_shape=2.
    input_dim, action_shape = 4, 2
    key = jax.random.PRNGKey(0)
    k_params, k_x1, k_x2 = jax.random.split(key, 3)
    params = init_params(k_params, input_dim, action_shape)

    # --- case 1: tiny batch (single grid step, no batch padding) ----------
    x_small = jax.random.normal(k_x1, (8, input_dim), jnp.float32)
    out_small = jax.block_until_ready(policy_forward(x_small, params))
    ref_small = reference_forward(x_small, params)
    assert out_small.shape == (8, action_shape)
    assert jnp.allclose(jnp.sum(out_small, axis=1), 1.0, atol=1e-3)
    assert jnp.allclose(out_small, ref_small, atol=2e-2, rtol=2e-2)

    # --- case 2: larger batch -> 2-step grid (TB=304, Bp=608) -------------
    x_big = jax.random.normal(k_x2, (600, input_dim), jnp.float32)
    out_big = jax.block_until_ready(policy_forward(x_big, params))
    ref_big = reference_forward(x_big, params)
    assert out_big.shape == (600, action_shape)
    assert jnp.allclose(jnp.sum(out_big, axis=1), 1.0, atol=1e-3)
    assert jnp.allclose(out_big, ref_big, atol=2e-2, rtol=2e-2)

    print("KERNEL_OK")
</pallas_src>

<mosaic_0001>
module attributes {stable_mosaic.version = 11 : i64} {
  func.func @policy_kernel(%arg0: i32, %arg1: memref<8x4xf32, #tpu.memory_space<vmem>>, %arg2: memref<4x128xf32, #tpu.memory_space<vmem>>, %arg3: memref<1x128xf32, #tpu.memory_space<vmem>>, %arg4: memref<128x128xf32, #tpu.memory_space<vmem>>, %arg5: memref<1x128xf32, #tpu.memory_space<vmem>>, %arg6: memref<128x128xf32, #tpu.memory_space<vmem>>, %arg7: memref<1x128xf32, #tpu.memory_space<vmem>>, %arg8: memref<8x2xf32, #tpu.memory_space<vmem>>) attributes {dimension_semantics = [#tpu.dimension_semantics<parallel>], iteration_bounds = array<i64: 1>, scalar_prefetch = 0 : i64, scratch_operands = 0 : i64, tpu.core_type = #tpu.core_type<tc>, window_params = [{transform_indices = @transform_0, window_bounds = array<i64: 8, 4>}, {pipeline_mode = #tpu.pipeline_mode<synchronous>, transform_indices = @transform_1, window_bounds = array<i64: 4, 128>}, {pipeline_mode = #tpu.pipeline_mode<synchronous>, transform_indices = @transform_2, window_bounds = array<i64: 1, 128>}, {pipeline_mode = #tpu.pipeline_mode<synchronous>, transform_indices = @transform_3, window_bounds = array<i64: 128, 128>}, {pipeline_mode = #tpu.pipeline_mode<synchronous>, transform_indices = @transform_4, window_bounds = array<i64: 1, 128>}, {pipeline_mode = #tpu.pipeline_mode<synchronous>, transform_indices = @transform_5, window_bounds = array<i64: 128, 128>}, {pipeline_mode = #tpu.pipeline_mode<synchronous>, transform_indices = @transform_6, window_bounds = array<i64: 1, 128>}, {transform_indices = @transform_7, window_bounds = array<i64: 8, 2>}]} {
    %c0 = arith.constant 0 : index
    %c0_0 = arith.constant 0 : index
    %0 = vector.load %arg1[%c0, %c0_0] : memref<8x4xf32, #tpu.memory_space<vmem>>, vector<8x4xf32>
    %c0_1 = arith.constant 0 : index
    %c0_2 = arith.constant 0 : index
    %1 = vector.load %arg2[%c0_1, %c0_2] : memref<4x128xf32, #tpu.memory_space<vmem>>, vector<4x128xf32>
    %2 = vector.extract_strided_slice %0 {offsets = [0, 0], sizes = [8, 1], strides = [1, 1]} : vector<8x4xf32> to vector<8x1xf32>
    %3 = vector.extract_strided_slice %1 {offsets = [0, 0], sizes = [1, 128], strides = [1, 1]} : vector<4x128xf32> to vector<1x128xf32>
    %4 = vector.broadcast %2 : vector<8x1xf32> to vector<8x128xf32>
    %5 = vector.broadcast %3 : vector<1x128xf32> to vector<8x128xf32>
    %6 = arith.mulf %4, %5 : vector<8x128xf32>
    %7 = vector.extract_strided_slice %0 {offsets = [0, 1], sizes = [8, 1], strides = [1, 1]} : vector<8x4xf32> to vector<8x1xf32>
    %8 = vector.extract_strided_slice %1 {offsets = [1, 0], sizes = [1, 128], strides = [1, 1]} : vector<4x128xf32> to vector<1x128xf32>
    %9 = vector.broadcast %7 : vector<8x1xf32> to vector<8x128xf32>
    %10 = vector.broadcast %8 : vector<1x128xf32> to vector<8x128xf32>
    %11 = arith.mulf %9, %10 : vector<8x128xf32>
    %12 = arith.addf %6, %11 : vector<8x128xf32>
    %13 = vector.extract_strided_slice %0 {offsets = [0, 2], sizes = [8, 1], strides = [1, 1]} : vector<8x4xf32> to vector<8x1xf32>
    %14 = vector.extract_strided_slice %1 {offsets = [2, 0], sizes = [1, 128], strides = [1, 1]} : vector<4x128xf32> to vector<1x128xf32>
    %15 = vector.broadcast %13 : vector<8x1xf32> to vector<8x128xf32>
    %16 = vector.broadcast %14 : vector<1x128xf32> to vector<8x128xf32>
    %17 = arith.mulf %15, %16 : vector<8x128xf32>
    %18 = arith.addf %12, %17 : vector<8x128xf32>
    %19 = vector.extract_strided_slice %0 {offsets = [0, 3], sizes = [8, 1], strides = [1, 1]} : vector<8x4xf32> to vector<8x1xf32>
    %20 = vector.extract_strided_slice %1 {offsets = [3, 0], sizes = [1, 128], strides = [1, 1]} : vector<4x128xf32> to vector<1x128xf32>
    %21 = vector.broadcast %19 : vector<8x1xf32> to vector<8x128xf32>
    %22 = vector.broadcast %20 : vector<1x128xf32> to vector<8x128xf32>
    %23 = arith.mulf %21, %22 : vector<8x128xf32>
    %24 = arith.addf %18, %23 : vector<8x128xf32>
    %c0_3 = arith.constant 0 : index
    %c0_4 = arith.constant 0 : index
    %25 = vector.load %arg3[%c0_3, %c0_4] : memref<1x128xf32, #tpu.memory_space<vmem>>, vector<1x128xf32>
    %26 = vector.broadcast %25 : vector<1x128xf32> to vector<8x128xf32>
    %27 = arith.addf %24, %26 : vector<8x128xf32>
    %cst = arith.constant 0.000000e+00 : f32
    %28 = vector.broadcast %cst : f32 to vector<8x128xf32>
    %29 = arith.maximumf %27, %28 : vector<8x128xf32>
    %c0_5 = arith.constant 0 : index
    %c0_6 = arith.constant 0 : index
    %30 = vector.load %arg4[%c0_5, %c0_6] : memref<128x128xf32, #tpu.memory_space<vmem>>, vector<128x128xf32>
    %cst_7 = arith.constant dense<0.000000e+00> : vector<8x128xf32>
    %31 = tpu.matmul %29, %30, %cst_7 {dimension_numbers = #tpu.dot_dimension_numbers<[1], [0], [0], [1], [0, 0, 1, 1], [], []>} : vector<8x128xf32>, vector<128x128xf32>, vector<8x128xf32> -> vector<8x128xf32>
    %c0_8 = arith.constant 0 : index
    %c0_9 = arith.constant 0 : index
    %32 = vector.load %arg5[%c0_8, %c0_9] : memref<1x128xf32, #tpu.memory_space<vmem>>, vector<1x128xf32>
    %33 = vector.broadcast %32 : vector<1x128xf32> to vector<8x128xf32>
    %34 = arith.addf %31, %33 : vector<8x128xf32>
    %cst_10 = arith.constant 0.000000e+00 : f32
    %35 = vector.broadcast %cst_10 : f32 to vector<8x128xf32>
    %36 = arith.maximumf %34, %35 : vector<8x128xf32>
    %c0_11 = arith.constant 0 : index
    %c0_12 = arith.constant 0 : index
    %37 = vector.load %arg6[%c0_11, %c0_12] : memref<128x128xf32, #tpu.memory_space<vmem>>, vector<128x128xf32>
    %cst_13 = arith.constant dense<0.000000e+00> : vector<8x128xf32>
    %38 = tpu.matmul %36, %37, %cst_13 {dimension_numbers = #tpu.dot_dimension_numbers<[1], [0], [0], [1], [0, 0, 1, 1], [], []>} : vector<8x128xf32>, vector<128x128xf32>, vector<8x128xf32> -> vector<8x128xf32>
    %c0_14 = arith.constant 0 : index
    %c0_15 = arith.constant 0 : index
    %39 = vector.load %arg7[%c0_14, %c0_15] : memref<1x128xf32, #tpu.memory_space<vmem>>, vector<1x128xf32>
    %40 = vector.broadcast %39 : vector<1x128xf32> to vector<8x128xf32>
    %41 = arith.addf %38, %40 : vector<8x128xf32>
    %42 = vector.extract_strided_slice %41 {offsets = [0, 0], sizes = [8, 2], strides = [1, 1]} : vector<8x128xf32> to vector<8x2xf32>
    %cst_16 = arith.constant dense<0xFF800000> : vector<8xf32>
    %43 = vector.multi_reduction <maximumf>, %42, %cst_16 [1] : vector<8x2xf32> to vector<8xf32>
    %44 = vector.shape_cast %43 : vector<8xf32> to vector<8x1xf32>
    %45 = vector.broadcast %44 : vector<8x1xf32> to vector<8x2xf32>
    %46 = arith.subf %42, %45 : vector<8x2xf32>
    %47 = math.exp %46 : vector<8x2xf32>
    %cst_17 = arith.constant dense<0.000000e+00> : vector<8xf32>
    %48 = vector.multi_reduction <add>, %47, %cst_17 [1] : vector<8x2xf32> to vector<8xf32>
    %49 = vector.shape_cast %48 : vector<8xf32> to vector<8x1xf32>
    %50 = vector.broadcast %49 : vector<8x1xf32> to vector<8x2xf32>
    %51 = arith.divf %47, %50 : vector<8x2xf32>
    %c0_18 = arith.constant 0 : index
    %c0_19 = arith.constant 0 : index
    %52 = vector.load %arg8[%c0_18, %c0_19] : memref<8x2xf32, #tpu.memory_space<vmem>>, vector<8x2xf32>
    tpu.vector_store %arg8[%c0_18, %c0_19], %51 {strides = array<i32>} : memref<8x2xf32, #tpu.memory_space<vmem>>, vector<8x2xf32>,
    return
  }
  func.func @transform_0(%arg0: i32) -> (i32, i32) {
    %c0_i32 = arith.constant 0 : i32
    %c0_i32_0 = arith.constant 0 : i32
    return %arg0, %c0_i32 : i32, i32
  }
  func.func @transform_1(%arg0: i32) -> (i32, i32) {
    %c0_i32 = arith.constant 0 : i32
    %c0_i32_0 = arith.constant 0 : i32
    %c0_i32_1 = arith.constant 0 : i32
    return %c0_i32, %c0_i32_0 : i32, i32
  }
  func.func @transform_2(%arg0: i32) -> (i32, i32) {
    %c0_i32 = arith.constant 0 : i32
    %c0_i32_0 = arith.constant 0 : i32
    %c0_i32_1 = arith.constant 0 : i32
    return %c0_i32, %c0_i32_0 : i32, i32
  }
  func.func @transform_3(%arg0: i32) -> (i32, i32) {
    %c0_i32 = arith.constant 0 : i32
    %c0_i32_0 = arith.constant 0 : i32
    %c0_i32_1 = arith.constant 0 : i32
    return %c0_i32, %c0_i32_0 : i32, i32
  }
  func.func @transform_4(%arg0: i32) -> (i32, i32) {
    %c0_i32 = arith.constant 0 : i32
    %c0_i32_0 = arith.constant 0 : i32
    %c0_i32_1 = arith.constant 0 : i32
    return %c0_i32, %c0_i32_0 : i32, i32
  }
  func.func @transform_5(%arg0: i32) -> (i32, i32) {
    %c0_i32 = arith.constant 0 : i32
    %c0_i32_0 = arith.constant 0 : i32
    %c0_i32_1 = arith.constant 0 : i32
    return %c0_i32, %c0_i32_0 : i32, i32
  }
  func.func @transform_6(%arg0: i32) -> (i32, i32) {
    %c0_i32 = arith.constant 0 : i32
    %c0_i32_0 = arith.constant 0 : i32
    %c0_i32_1 = arith.constant 0 : i32
    return %c0_i32, %c0_i32_0 : i32, i32
  }
  func.func @transform_7(%arg0: i32) -> (i32, i32) {
    %c0_i32 = arith.constant 0 : i32
    %c0_i32_0 = arith.constant 0 : i32
    return %arg0, %c0_i32 : i32, i32
  }
}

</mosaic_0001>

<bundles_post_ra>
// kernel: tpu_custom_call.1
= control target key start
LH: loop header
LB: loop body
LE: loop exit
PB: predicated region body
PF: predicated region fallthrough
CT: control target
= control target key end

     0   :  { %12 = vsyncpa [#allocation3], 0  ;;  %s592_s0 = inlined_call_operand.vmem [shape: f32[8,4], index: 0, kind: input, shape index: {}]   ;;  %s593_s1 = inlined_call_operand.vmem [shape: f32[4,128], index: 1, kind: input, shape index: {}]   ;;  %s594_s2 = inlined_call_operand.vmem [shape: f32[1,128], index: 2, kind: input, shape index: {}]   ;;  %s595_s3 = inlined_call_operand.hbm [shape: f32[128,128], index: 3, kind: input, shape index: {}]   ;;  %s596_s4 = inlined_call_operand.vmem [shape: f32[1,128], index: 4, kind: input, shape index: {}]   ;;  %s597_s5 = inlined_call_operand.hbm [shape: f32[128,128], index: 5, kind: input, shape index: {}]   ;;  %s598_s6 = inlined_call_operand.vmem [shape: f32[1,128], index: 6, kind: input, shape index: {}]   ;;  %s599_s7 = inlined_call_operand.vmem [shape: f32[8,2], index: 7, kind: output, shape index: {}]  }
   0x1   :  { %13 = vsyncpa [#allocation5], 0  ;;  %s481_s24 = smov [#allocation2]  }
   0x2   :  { %s25_s25 = sshll.u32 %s481_s24, 4  ;;  %s26_s25 = int_to_ptr.vmem [resolvable:$true] %s25_s25 }
   0x3   :  { %s445_s26 = scalar_lea.vmem %s26_s25, 2048  ;;  %p450_p1 = scmp.lt.s32.totalorder %s26_s25, %s26_s25 }
   0x4   :  { %p446_p0 = scmp.ne.s32.totalorder %s26_s25, %s445_s26  ;;  %p451_p2 = scmp.lt.s32.totalorder %s445_s26, %s445_s26 }
   0x6   :  { %p452_p3 = por %p451_p2, %p450_p1 }
   0x8   :  { %p453_p4 = pnand %p452_p3, %p446_p0 }
   0xa   :  { %456 = shalt.err (!%p453_p4)
}
   0xb   :  { %s482_s27 = smov 128   ;;  %s483_s28 = smov 8  }
   0xc   :  { %31 = dma.hbm_to_vmem [thread:$0]  %s595_s3, 2048, %s26_s25, [#allocation3], %s482_s27, %s482_s27, %s483_s28  }
   0xd   :  { %s484_s8 = smov [#allocation4]  }
   0xe   :  { %s39_s9 = sshll.u32 %s484_s8, 4  ;;  %s40_s9 = int_to_ptr.vmem [resolvable:$true] %s39_s9 }
   0xf   :  { %s465_s10 = scalar_lea.vmem %s40_s9, 2048  ;;  %p470_p6 = scmp.lt.s32.totalorder %s40_s9, %s40_s9 }
  0x10   :  { %p466_p5 = scmp.ne.s32.totalorder %s40_s9, %s465_s10  ;;  %p471_p7 = scmp.lt.s32.totalorder %s465_s10, %s465_s10 }
  0x12   :  { %p472_p8 = por %p471_p7, %p470_p6 }
  0x14   :  { %p473_p9 = pnand %p472_p8, %p466_p5 }
  0x16   :  { %476 = shalt.err (!%p473_p9)
}
  0x17   :  { %45 = dma.hbm_to_vmem [thread:$0]  %s597_s5, 2048, %s40_s9, [#allocation5], %s482_s27, %s482_s27, %s483_s28  }
  0x18   :  { %477 = dma.done.wait [#allocation3], 2048  }
  0x19   :  { %478 = vsyncadd [#allocation3], 4294965248 }
  0x1a   :  { %479 = dma.done.wait [#allocation5], 2048  }
  0x1b   :  { %480 = vsyncadd [#allocation5], 4294965248  ;;  %v485_v0 = vmov 0   ;;  %v486_v1 = vmov 2   ;;  %v487_v2 = vmov 0.0   ;;  %v54_v3 = vld [vmem:[%s592_s0] sm:$0xff]  ;;  %v61_v35 = vlaneseq }
  0x1c   :  { %428 = vset.pattern.permute.xlu0 %v485_v0  ;;  %430 = vset.pattern.permute.xlu1 %v486_v1  ;;  %v120_v4 = vld [vmem:[#allocation2 + $0x78] sm:$0xff]  ;;  %v119_v5 = vld [vmem:[#allocation2 + $0x70] sm:$0xff]  ;;  %v488_v6 = vmov 1   ;;  %v489_v7 = vmov 3   ;;  %v118_v8 = vld [vmem:[#allocation2 + $0x68] sm:$0xff]  ;;  %vm490_vm0 = vmmov 0  }
  0x1d   :  { %348 = vmatprep.subr.mxu0 %v487_v2  ;;  %383 = vmatprep.subr.mxu1 %v487_v2  ;;  %v117_v9 = vld [vmem:[#allocation2 + $0x60] sm:$0xff]  ;;  %v116_v10 = vld [vmem:[#allocation2 + $0x58] sm:$0xff]  ;;  %v115_v11 = vld [vmem:[#allocation2 + $0x50] sm:$0xff]  ;;  %v62_v36 = vshrl.u32 %v61_v35, 7  ;;  %vm292_vm1 = vcmask 15360  }
  0x1e   :  { %58 = vperm.xlu0 %428, %v54_v3   ;;  %77 = vperm.xlu1 %430, %v54_v3   ;;  %v114_v12 = vld [vmem:[#allocation2 + $0x48] sm:$0xff]  ;;  %v214_v13 = vld [vmem:[#allocation4 + $0x78] sm:$0xff]  ;;  %v213_v14 = vld [vmem:[#allocation4 + $0x70] sm:$0xff] }
  0x1f   :  { %349 = vmatpush3.msra.mxu0 %v120_v4  ;;  %380 = vmatprep.mubr.msk.f32.mxu0 %vm490_vm0, %v487_v2  ;;  %v113_v15 = vld [vmem:[#allocation2 + $0x40] sm:$0xff]  ;;  %v212_v16 = vld [vmem:[#allocation4 + $0x68] sm:$0xff]  ;;  %v112_v17 = vld [vmem:[#allocation2 + $0x38] sm:$0xff]  ;;  %v63_v37 = vsub.s32 0, %v62_v36  ;;  %v72_v38 = vsub.s32 1, %v62_v36  ;;  %v82_v41 = vsub.s32 2, %v62_v36 }
  0x20   :  { %350 = vmatprep.subr.mxu0 %v487_v2  ;;  %415 = vmatprep.mubr.msk.f32.mxu1 %vm490_vm0, %v487_v2  ;;  %v211_v18 = vld [vmem:[#allocation4 + $0x60] sm:$0xff]  ;;  %v111_v19 = vld [vmem:[#allocation2 + $0x30] sm:$0xff]  ;;  %v210_v20 = vld [vmem:[#allocation4 + $0x58] sm:$0xff]  ;;  %v92_v43 = vsub.s32 3, %v62_v36 }
  0x21   :  { %351 = vmatpush3.msra.mxu0 %v119_v5  ;;  %384 = vmatpush3.msra.mxu1 %v214_v13  ;;  %v110_v21 = vld [vmem:[#allocation2 + $0x28] sm:$0xff]  ;;  %v209_v22 = vld [vmem:[#allocation4 + $0x50] sm:$0xff]  ;;  %v109_v23 = vld [vmem:[#allocation2 + $0x20] sm:$0xff] }
  0x22   :  { %429 = vset.pattern.permute.xlu0 %v488_v6  ;;  %431 = vset.pattern.permute.xlu1 %v489_v7  ;;  %v208_v24 = vld [vmem:[#allocation4 + $0x48] sm:$0xff]  ;;  %v108_v25 = vld [vmem:[#allocation2 + $0x18] sm:$0xff]  ;;  %v207_v26 = vld [vmem:[#allocation4 + $0x40] sm:$0xff] }
  0x23   :  { %67 = vperm.xlu0 %429, %v54_v3   ;;  %87 = vperm.xlu1 %431, %v54_v3   ;;  %v107_v27 = vld [vmem:[#allocation2 + $0x10] sm:$0xff]  ;;  %v206_v28 = vld [vmem:[#allocation4 + $0x38] sm:$0xff]  ;;  %v106_v29 = vld [vmem:[#allocation2 + $0x8] sm:$0xff] }
  0x24   :  { %352 = vmatprep.subr.mxu0 %v487_v2  ;;  %385 = vmatprep.subr.mxu1 %v487_v2  ;;  %v205_v30 = vld [vmem:[#allocation4 + $0x30] sm:$0xff]  ;;  %v105_v31 = vld [vmem:[#allocation2] sm:$0xff]  ;;  %v204_v32 = vld [vmem:[#allocation4 + $0x28] sm:$0xff] }
  0x25   :  { %353 = vmatpush3.msra.mxu0 %v118_v8  ;;  %386 = vmatpush3.msra.mxu1 %v213_v14  ;;  %v203_v33 = vld [vmem:[#allocation4 + $0x20] sm:$0xff]  ;;  %v202_v34 = vld [vmem:[#allocation4 + $0x18] sm:$0xff]  ;;  %v201_v60 = vld [vmem:[#allocation4 + $0x10] sm:$0xff] }
  0x26   :  { %354 = vmatprep.subr.mxu0 %v487_v2  ;;  %387 = vmatprep.subr.mxu1 %v487_v2  ;;  %v55_v39 = vld [vmem:[%s593_s1] sm:$0xf]  ;;  %v200_v61 = vld [vmem:[#allocation4 + $0x8] sm:$0xff] }
  0x27   :  { %355 = vmatpush3.msra.mxu0 %v117_v9  ;;  %432 = vset.pattern.permute.xlu0 %v489_v7  ;;  %v64_v44 = vrot.slane %v55_v39, %v63_v37  ;;  %v73_v45 = vrot.slane %v55_v39, %v72_v38  ;;  %v83_v46 = vrot.slane %v55_v39, %v82_v41  ;;  %v311_v56 = vld [vmem:[%s594_s2] ss:$0 sm:$0xff] }
  0x28   :  { %356 = vmatprep.subr.mxu0 %v487_v2  ;;  %388 = vmatpush3.msra.mxu1 %v212_v16  ;;  %v93_v47 = vrot.slane %v55_v39, %v92_v43  ;;  %v199_v62 = vld [vmem:[#allocation4] sm:$0xff] }
  0x29   :  { %357 = vmatpush3.msra.mxu0 %v116_v10  ;;  %389 = vmatprep.subr.mxu1 %v487_v2  ;;  %v312_v63 = vld [vmem:[%s596_s4] ss:$0 sm:$0xff] }
  0x2a   :  { %358 = vmatprep.subr.mxu0 %v487_v2  ;;  %390 = vmatpush3.msra.mxu1 %v211_v18  ;;  %v313_v5 = vld [vmem:[%s598_s6] ss:$0 sm:$0xff] }
  0x2b   :  { %359 = vmatpush3.msra.mxu0 %v115_v11  ;;  %391 = vmatprep.subr.mxu1 %v487_v2 }
  0x2c   :  { %360 = vmatprep.subr.mxu0 %v487_v2  ;;  %392 = vmatpush3.msra.mxu1 %v210_v20 }
  0x2d   :  { %361 = vmatpush3.msra.mxu0 %v114_v12  ;;  %393 = vmatprep.subr.mxu1 %v487_v2 }
  0x2e   :  { %362 = vmatprep.subr.mxu0 %v487_v2  ;;  %394 = vmatpush3.msra.mxu1 %v209_v22 }
  0x2f   :  { %363 = vmatpush3.msra.mxu0 %v113_v15  ;;  %395 = vmatprep.subr.mxu1 %v487_v2 }
  0x30   :  { %364 = vmatprep.subr.mxu0 %v487_v2  ;;  %396 = vmatpush3.msra.mxu1 %v208_v24 }
  0x31   :  { %365 = vmatpush3.msra.mxu0 %v112_v17  ;;  %397 = vmatprep.subr.mxu1 %v487_v2 }
  0x32   :  { %366 = vmatprep.subr.mxu0 %v487_v2  ;;  %398 = vmatpush3.msra.mxu1 %v207_v26 }
  0x33   :  { %367 = vmatpush3.msra.mxu0 %v111_v19  ;;  %399 = vmatprep.subr.mxu1 %v487_v2 }
  0x34   :  { %368 = vmatprep.subr.mxu0 %v487_v2  ;;  %400 = vmatpush3.msra.mxu1 %v206_v28 }
  0x35   :  { %369 = vmatpush3.msra.mxu0 %v110_v21  ;;  %401 = vmatprep.subr.mxu1 %v487_v2 }
  0x36   :  { %370 = vmatprep.subr.mxu0 %v487_v2  ;;  %402 = vmatpush3.msra.mxu1 %v205_v30 }
  0x37   :  { %371 = vmatpush3.msra.mxu0 %v109_v23  ;;  %403 = vmatprep.subr.mxu1 %v487_v2 }
  0x38   :  { %372 = vmatprep.subr.mxu0 %v487_v2  ;;  %404 = vmatpush3.msra.mxu1 %v204_v32 }
  0x39   :  { %373 = vmatpush3.msra.mxu0 %v108_v25  ;;  %405 = vmatprep.subr.mxu1 %v487_v2 }
  0x3a   :  { %374 = vmatprep.subr.mxu0 %v487_v2  ;;  %406 = vmatpush3.msra.mxu1 %v203_v33 }
  0x3b   :  { %375 = vmatpush3.msra.mxu0 %v107_v27  ;;  %407 = vmatprep.subr.mxu1 %v487_v2 }
  0x3c   :  { %376 = vmatprep.subr.mxu0 %v487_v2  ;;  %408 = vmatpush3.msra.mxu1 %v202_v34 }
  0x3d   :  { %377 = vmatpush3.msra.mxu0 %v106_v29  ;;  %409 = vmatprep.subr.mxu1 %v487_v2 }
  0x3e   :  { %378 = vmatprep.subr.mxu0 %v487_v2  ;;  %410 = vmatpush3.msra.mxu1 %v201_v60 }
  0x3f   :  { %379 = vmatpush3.msra.mxu0 %v105_v31  ;;  %411 = vmatprep.subr.mxu1 %v487_v2 }
  0x40   :  { %412 = vmatpush3.msra.mxu1 %v200_v61 }
  0x41   :  { %413 = vmatprep.subr.mxu1 %v487_v2 }
  0x42   :  { %414 = vmatpush3.msra.mxu1 %v199_v62 }
  0x99   :  { %v59_v40 = vpop.permute.xlu0 %58  ;;  %v78_v42 = vpop.permute.xlu1 %77 }
  0x9a   :  { %v65_v50 = vmul.f32 %v64_v44, %v59_v40  ;;  %v84_v52 = vmul.f32 %v83_v46, %v78_v42 }
  0x9e   :  { %v68_v48 = vpop.permute.xlu0 %67  ;;  %v88_v49 = vpop.permute.xlu1 %87 }
  0x9f   :  { %v74_v51 = vmul.f32 %v73_v45, %v68_v48  ;;  %v94_v54 = vmul.f32 %v93_v47, %v88_v49 }
  0xa1   :  { %v75_v53 = vadd.f32 %v74_v51, %v65_v50 }
  0xa3   :  { %v85_v55 = vadd.f32 %v84_v52, %v75_v53 }
  0xa5   :  { %v95_v57 = vadd.f32 %v94_v54, %v85_v55 }
  0xa7   :  { %v103_v58 = vadd.f32 %v311_v56, %v95_v57 }
  0xa9   :  { %v104_v59 = vmax.f32 %v103_v58, 0.0 }
  0xab   :  { %381 = vmatmul.mubr.f32.vlgmr.msra.gmra.mxu0 %v104_v59 }
 0x16b   :  { %v194_v0 = vpop.f32.mrf.mxu0 }
 0x16c   :  { %v195_v1 = vadd.f32 %v312_v63, %v194_v0 }
 0x16d   :  { %v382_v3 = vpop.f32.mrf.mxu0 }
 0x16e   :  { %v198_v4 = vmax.f32 %v195_v1, 0.0 }
 0x170   :  { %416 = vmatmul.mubr.f32.vlgmr.msra.gmra.mxu1 %v198_v4 }
 0x230   :  { %v288_v6 = vpop.f32.mrf.mxu1 }
 0x231   :  { %v289_v7 = vadd.f32 %v313_v5, %v288_v6 }
 0x232   :  { %v417_v8 = vpop.f32.mrf.mxu1 }
 0x233   :  { %v293_v2 = vsel %vm292_vm1, %v289_v7, -inf }
 0x234   :  { %294 = vmax.xlane.f32.xlu1 %v293_v2 }
 0x2bd   :  { %v295_v9 = vpop.xlane.xlu1 %294 }
 0x2be   :  { %v296_v10 = vsub.f32 %v289_v7, %v295_v9 }
 0x2c0   :  { %v297_v11 = vmul.f32 1.442695, %v296_v10 }
 0x2c2   :  { %433 = vpow2.f32 %v297_v11 }
 0x2cf   :  { %v434_v12 = vpop.eup %433 }
 0x2d0   :  { %v299_v13 = vsel %vm292_vm1, %v434_v12, 0.0 }
 0x2d1   :  { %300 = vadd.xlane.f32.xlu0 %v299_v13 }
 0x35a   :  { %v301_v14 = vpop.xlane.xlu0 %300 }
 0x35b   :  { %435 = vrcp.f32 %v301_v14 }
 0x368   :  { %v436_v15 = vpop.eup %435 }
 0x369   :  { %v303_v16 = vmul.f32 %v436_v15, %v434_v12 }
 0x36b   :  { %304 = vst.msk [vmem:[%s599_s7] sm:$0xff] %vm292_vm1, %v303_v16 }
 0x36c   :  { %309 = vsyncpa [#allocation3], 1 }
 0x36d   :  { %310 = vsyncpa [#allocation5], 1 }

</bundles_post_ra>
